<compile_context>
chip_gen: v5e
topology: v5e:2x2
jax: 0.10.0
libtpu: 0.0.40
codegen_flags: <defaults>
</compile_context>

<pallas_src>
import functools

import jax
import jax.numpy as jnp
from jax import lax
from jax.experimental import pallas as pl
from jax.experimental.pallas import tpu as pltpu

_LANE = 128


# ----------------------------------------------------------------------------
# Kernels
# ----------------------------------------------------------------------------
def _ln_plain_kernel(z_ref, a_ref, b_ref, o_ref, *, hidden, eps):
    """Row-wise layer norm; hidden dim == lane dim (used when H >= 128 etc.)."""
    z = z_ref[...].astype(jnp.float32)                       # (TB, H)
    mu = jnp.mean(z, axis=-1, keepdims=True)
    diff = z - mu
    ddof = hidden - 1 if hidden > 1 else 1
    var = jnp.sum(diff * diff, axis=-1, keepdims=True) * jnp.float32(1.0 / ddof)
    sigma = jnp.sqrt(var)
    o = diff / (sigma + jnp.float32(eps)) * a_ref[...] + b_ref[...]
    o_ref[...] = o.astype(o_ref.dtype)


def _ln_packed_kernel(z_ref, a_ref, b_ref, p_ref, o_ref, *, hidden, eps):
    """Lane-dense path: each 128-wide lane row holds k = 128 // hidden rows.

    p_ref is a (128, 128) block-diagonal ones matrix, so `z @ P` yields each
    element's per-segment sum already broadcast across its segment (one MXU
    matmul per statistic; MXU is otherwise idle in this streaming kernel).
    """
    z = z_ref[...].astype(jnp.float32)                        # (TB, 128)
    p = p_ref[...]                                            # (128, 128) f32
    seg_sum = jnp.dot(z, p, preferred_element_type=jnp.float32,
                      precision=lax.Precision.HIGHEST)
    mu = seg_sum * jnp.float32(1.0 / hidden)
    diff = z - mu
    ddof = hidden - 1 if hidden > 1 else 1
    seg_sq = jnp.dot(diff * diff, p, preferred_element_type=jnp.float32,
                     precision=lax.Precision.HIGHEST)
    sigma = jnp.sqrt(seg_sq * jnp.float32(1.0 / ddof))
    o = diff / (sigma + jnp.float32(eps)) * a_ref[...] + b_ref[...]
    o_ref[...] = o.astype(o_ref.dtype)


# ----------------------------------------------------------------------------
# Sizing helpers
# ----------------------------------------------------------------------------
def _vmem_limit_bytes():
    """Generation-aware scoped-VMEM request (leaves Mosaic scratch headroom)."""
    cap = None
    try:
        cap = getattr(pltpu.get_tpu_info(), "vmem_capacity_bytes", None)
    except Exception:
        cap = None
    if not cap:
        cap = 64 * 1024 * 1024  # conservative fallback (fits every generation)
    # ~75% of physical, never above 100 MiB: v5e/v6e (128 MiB) -> 96 MiB,
    # v7x (64 MiB) -> 48 MiB.
    return int(min(cap * 3 // 4, 100 * 1024 * 1024))


def _row_tile(rows, width, itemsize, vmem_limit):
    """Largest sublane-aligned row tile whose *true* footprint fits the budget.

    Footprint per tile row = (2 in + 2 out) double buffers in the native dtype
    plus ~3 full-tile f32 temporaries (f32 upcast, diff, matmul/sum result)
    materialized by the kernel body.
    """
    sublane = {4: 8, 2: 16, 1: 32}.get(itemsize, 8)
    bytes_per_row = width * (4 * itemsize + 3 * 4)
    budget = (vmem_limit * 4) // 5            # ~80%: params / P / misc headroom
    tb = max(1, budget // max(1, bytes_per_row))
    if tb >= rows:
        return rows                           # full-dim block: always legal
    return min(rows, max(sublane, (tb // sublane) * sublane))


# ----------------------------------------------------------------------------
# Wrapper
# ----------------------------------------------------------------------------
def layer_normalization(z, a2, b2, *, eps=1e-5):
    """Pallas TPU implementation of the PyTorch LayerNormalization.forward."""
    assert z.ndim == 2, "expected (batch, hidden)"
    B, H = z.shape
    dtype = z.dtype
    itemsize = jnp.dtype(dtype).itemsize
    vmem_limit = _vmem_limit_bytes()

    a_f32 = a2.astype(jnp.float32).reshape(1, H)
    b_f32 = b2.astype(jnp.float32).reshape(1, H)

    # Lane-dense packing: fold k = 128 // H rows into one 128-wide lane row.
    k = _LANE // H if (H < _LANE and _LANE % H == 0) else 1
    packed = (k > 1) and (B % k == 0)

    if packed:
        rows, width = B // k, k * H            # width == 128
        z_in = z.reshape(rows, width)
        a_in = jnp.tile(a_f32, (1, k))
        b_in = jnp.tile(b_f32, (1, k))
        seg = jnp.arange(width, dtype=jnp.int32) // H
        p = (seg[:, None] == seg[None, :]).astype(jnp.float32)   # block-diag 1s
        kernel = functools.partial(_ln_packed_kernel, hidden=H, eps=eps)
        extra_in = [p]
        extra_specs = [pl.BlockSpec((width, width), lambda i: (0, 0))]
        flops = 2 * (2 * rows * width * width) + 8 * rows * width
    else:
        rows, width = B, H
        z_in = z
        a_in, b_in = a_f32, b_f32
        kernel = functools.partial(_ln_plain_kernel, hidden=H, eps=eps)
        extra_in = []
        extra_specs = []
        flops = 10 * rows * width

    tb = _row_tile(rows, width, itemsize, vmem_limit)
    grid = (pl.cdiv(rows, tb),)

    cost = pl.CostEstimate(
        flops=int(flops),
        transcendentals=int(rows),
        bytes_accessed=int(2 * rows * width * itemsize + 2 * width * 4),
    )

    out = pl.pallas_call(
        kernel,
        out_shape=jax.ShapeDtypeStruct((rows, width), dtype),
        grid=grid,
        in_specs=[
            pl.BlockSpec((tb, width), lambda i: (i, 0)),   # z row tile
            pl.BlockSpec((1, width), lambda i: (0, 0)),    # a2 (f32, broadcast)
            pl.BlockSpec((1, width), lambda i: (0, 0)),    # b2 (f32, broadcast)
            *extra_specs,                                  # P (packed path only)
        ],
        out_specs=pl.BlockSpec((tb, width), lambda i: (i, 0)),
        compiler_params=pltpu.CompilerParams(
            # Row tiles are independent; "parallel" lets megacore shard them.
            # TODO(synk): try pltpu.CORE_PARALLEL on v7x if profiling shows the
            # row axis is not actually split across the two TensorCores.
            dimension_semantics=("parallel",),
            vmem_limit_bytes=vmem_limit,
        ),
        cost_estimate=cost,
    )(z_in, a_in, b_in, *extra_in)

    return out.reshape(B, H) if packed else out


# ----------------------------------------------------------------------------
# Demo / correctness check
# ----------------------------------------------------------------------------
def _reference(z, a2, b2, eps):
    mu = jnp.mean(z, axis=1, keepdims=True)
    sigma = jnp.std(z, axis=1, keepdims=True, ddof=1)   # unbiased, like torch.std
    return (z - mu) / (sigma + eps) * a2 + b2


if __name__ == "__main__":
    key = jax.random.PRNGKey(0)

    # --- Case 1: module-sized demo (H=32 < 128 -> lane-dense packed path) ---
    hidden_size, batch = 32, 8
    k1, k2 = jax.random.split(key)
    z = jax.random.normal(k1, (batch, hidden_size), dtype=jnp.float32)
    a2 = jnp.ones((1, hidden_size), dtype=jnp.float32)   # matches nn.Parameter init
    b2 = jnp.zeros((1, hidden_size), dtype=jnp.float32)

    out = layer_normalization(z, a2, b2, eps=1e-5)
    jax.block_until_ready(out)
    ref = _reference(z, a2, b2, 1e-5)
    assert out.shape == (batch, hidden_size)
    assert jnp.allclose(out, ref, atol=1e-5, rtol=1e-5)

    # --- Case 2: H >= 128 -> plain (already lane-dense) path, non-trivial affine ---
    hidden2, batch2 = 256, 16
    k3, k4, k5 = jax.random.split(k2, 3)
    z2 = jax.random.normal(k3, (batch2, hidden2), dtype=jnp.float32)
    a2b = 1.0 + 0.1 * jax.random.normal(k4, (1, hidden2), dtype=jnp.float32)
    b2b = 0.1 * jax.random.normal(k5, (1, hidden2), dtype=jnp.float32)

    out2 = layer_normalization(z2, a2b, b2b, eps=1e-5)
    jax.block_until_ready(out2)
    ref2 = _reference(z2, a2b, b2b, 1e-5)
    assert jnp.allclose(out2, ref2, atol=1e-5, rtol=1e-5)

    print("KERNEL_OK")
</pallas_src>

<mosaic_0001>
module attributes {stable_mosaic.version = 11 : i64} {
  func.func @_ln_packed_kernel(%arg0: i32, %arg1: memref<2x128xf32, #tpu.memory_space<vmem>>, %arg2: memref<1x128xf32, #tpu.memory_space<vmem>>, %arg3: memref<1x128xf32, #tpu.memory_space<vmem>>, %arg4: memref<128x128xf32, #tpu.memory_space<vmem>>, %arg5: memref<2x128xf32, #tpu.memory_space<vmem>>) attributes {dimension_semantics = [#tpu.dimension_semantics<parallel>], iteration_bounds = array<i64: 1>, scalar_prefetch = 0 : i64, scratch_operands = 0 : i64, tpu.core_type = #tpu.core_type<tc>, window_params = [{transform_indices = @transform_0, window_bounds = array<i64: 2, 128>}, {pipeline_mode = #tpu.pipeline_mode<synchronous>, transform_indices = @transform_1, window_bounds = array<i64: 1, 128>}, {pipeline_mode = #tpu.pipeline_mode<synchronous>, transform_indices = @transform_2, window_bounds = array<i64: 1, 128>}, {pipeline_mode = #tpu.pipeline_mode<synchronous>, transform_indices = @transform_3, window_bounds = array<i64: 128, 128>}, {transform_indices = @transform_4, window_bounds = array<i64: 2, 128>}]} {
    %c0 = arith.constant 0 : index
    %c0_0 = arith.constant 0 : index
    %0 = vector.load %arg1[%c0, %c0_0] : memref<2x128xf32, #tpu.memory_space<vmem>>, vector<2x128xf32>
    %c0_1 = arith.constant 0 : index
    %c0_2 = arith.constant 0 : index
    %1 = vector.load %arg4[%c0_1, %c0_2] : memref<128x128xf32, #tpu.memory_space<vmem>>, vector<128x128xf32>
    %cst = arith.constant dense<0.000000e+00> : vector<2x128xf32>
    %2 = tpu.matmul %0, %1, %cst {dimension_numbers = #tpu.dot_dimension_numbers<[1], [0], [0], [1], [0, 0, 1, 1], [], []>, precision = #tpu.contract_precision<fp32>} : vector<2x128xf32>, vector<128x128xf32>, vector<2x128xf32> -> vector<2x128xf32>
    %cst_3 = arith.constant 3.125000e-02 : f32
    %3 = vector.broadcast %cst_3 : f32 to vector<2x128xf32>
    %4 = arith.mulf %2, %3 : vector<2x128xf32>
    %5 = arith.subf %0, %4 : vector<2x128xf32>
    %6 = arith.mulf %5, %5 : vector<2x128xf32>
    %cst_4 = arith.constant dense<0.000000e+00> : vector<2x128xf32>
    %7 = tpu.matmul %6, %1, %cst_4 {dimension_numbers = #tpu.dot_dimension_numbers<[1], [0], [0], [1], [0, 0, 1, 1], [], []>, precision = #tpu.contract_precision<fp32>} : vector<2x128xf32>, vector<128x128xf32>, vector<2x128xf32> -> vector<2x128xf32>
    %cst_5 = arith.constant 0.0322580636 : f32
    %8 = vector.broadcast %cst_5 : f32 to vector<2x128xf32>
    %9 = arith.mulf %7, %8 : vector<2x128xf32>
    %10 = math.sqrt %9 : vector<2x128xf32>
    %cst_6 = arith.constant 9.99999974E-6 : f32
    %11 = vector.broadcast %cst_6 : f32 to vector<2x128xf32>
    %12 = arith.addf %10, %11 : vector<2x128xf32>
    %13 = arith.divf %5, %12 : vector<2x128xf32>
    %c0_7 = arith.constant 0 : index
    %c0_8 = arith.constant 0 : index
    %14 = vector.load %arg2[%c0_7, %c0_8] : memref<1x128xf32, #tpu.memory_space<vmem>>, vector<1x128xf32>
    %15 = vector.broadcast %14 : vector<1x128xf32> to vector<2x128xf32>
    %16 = arith.mulf %13, %15 : vector<2x128xf32>
    %c0_9 = arith.constant 0 : index
    %c0_10 = arith.constant 0 : index
    %17 = vector.load %arg3[%c0_9, %c0_10] : memref<1x128xf32, #tpu.memory_space<vmem>>, vector<1x128xf32>
    %18 = vector.broadcast %17 : vector<1x128xf32> to vector<2x128xf32>
    %19 = arith.addf %16, %18 : vector<2x128xf32>
    %c0_11 = arith.constant 0 : index
    %c0_12 = arith.constant 0 : index
    %20 = vector.load %arg5[%c0_11, %c0_12] : memref<2x128xf32, #tpu.memory_space<vmem>>, vector<2x128xf32>
    tpu.vector_store %arg5[%c0_11, %c0_12], %19 {strides = array<i32>} : memref<2x128xf32, #tpu.memory_space<vmem>>, vector<2x128xf32>,
    return
  }
  func.func @transform_0(%arg0: i32) -> (i32, i32) {
    %c0_i32 = arith.constant 0 : i32
    %c0_i32_0 = arith.constant 0 : i32
    return %arg0, %c0_i32 : i32, i32
  }
  func.func @transform_1(%arg0: i32) -> (i32, i32) {
    %c0_i32 = arith.constant 0 : i32
    %c0_i32_0 = arith.constant 0 : i32
    %c0_i32_1 = arith.constant 0 : i32
    return %c0_i32, %c0_i32_0 : i32, i32
  }
  func.func @transform_2(%arg0: i32) -> (i32, i32) {
    %c0_i32 = arith.constant 0 : i32
    %c0_i32_0 = arith.constant 0 : i32
    %c0_i32_1 = arith.constant 0 : i32
    return %c0_i32, %c0_i32_0 : i32, i32
  }
  func.func @transform_3(%arg0: i32) -> (i32, i32) {
    %c0_i32 = arith.constant 0 : i32
    %c0_i32_0 = arith.constant 0 : i32
    %c0_i32_1 = arith.constant 0 : i32
    return %c0_i32, %c0_i32_0 : i32, i32
  }
  func.func @transform_4(%arg0: i32) -> (i32, i32) {
    %c0_i32 = arith.constant 0 : i32
    %c0_i32_0 = arith.constant 0 : i32
    return %arg0, %c0_i32 : i32, i32
  }
}

</mosaic_0001>

<bundles_post_ra>
// kernel: tpu_custom_call.1
= control target key start
LH: loop header
LB: loop body
LE: loop exit
PB: predicated region body
PF: predicated region fallthrough
CT: control target
= control target key end

     0   :  { %9 = vsyncpa [#allocation3], 0  ;;  %s1376_s0 = inlined_call_operand.hbm [shape: f32[2,128], index: 0, kind: input, shape index: {}]   ;;  %s1377_s1 = inlined_call_operand.hbm [shape: f32[1,128], index: 1, kind: input, shape index: {}]   ;;  %s1378_s2 = inlined_call_operand.vmem [shape: f32[1,128], index: 2, kind: input, shape index: {}]   ;;  %s1379_s3 = inlined_call_operand.hbm [shape: f32[128,128], index: 3, kind: input, shape index: {}]   ;;  %s1380_s4 = inlined_call_operand.hbm [shape: f32[2,128], index: 4, kind: output, shape index: {}]  }
   0x1   :  { %10 = vsyncpa [#allocation6], 0  ;;  %s28_s17 = sshll.u32 %s1377_s1, 4  ;;  %s29_s17 = int_to_ptr.hbm [resolvable:$true] %s28_s17 }
   0x2   :  { %11 = vsyncpa [#allocation4], 0  ;;  %s935_s18 = smov [#allocation5]   ;;  %s17_s22 = sshll.u32 %s1376_s0, 4  ;;  %s18_s22 = int_to_ptr.hbm [resolvable:$true] %s17_s22 }
   0x3   :  { %s30_s19 = sshll.u32 %s935_s18, 4  ;;  %s936_s23 = smov [#allocation2]   ;;  %s31_s19 = int_to_ptr.vmem [resolvable:$true] %s30_s19 }
   0x4   :  { %33 = dma.hbm_to_vmem [thread:$0]  %s29_s17, 16, %s31_s19, [#allocation6]  }
   0x5   :  { %s19_s24 = sshll.u32 %s936_s23, 4  ;;  %s40_s27 = sshll.u32 %s1379_s3, 4  ;;  %s20_s24 = int_to_ptr.vmem [resolvable:$true] %s19_s24  ;;  %s41_s27 = int_to_ptr.hbm [resolvable:$true] %s40_s27 }
   0x6   :  { %22 = dma.hbm_to_vmem [thread:$0]  %s18_s22, 32, %s20_s24, [#allocation3]  }
   0x7   :  { %s937_s1 = smov [#allocation7]   ;;  %s938_s29 = smov 128  }
   0x8   :  { %s42_s28 = sshll.u32 %s937_s1, 4  ;;  %s939_s30 = smov 8   ;;  %s43_s28 = int_to_ptr.vmem [resolvable:$true] %s42_s28 }
   0x9   :  { %48 = dma.hbm_to_vmem [thread:$0]  %s41_s27, 2048, %s43_s28, [#allocation6], %s938_s29, %s938_s29, %s939_s30  }
   0xa   :  { %929 = dma.done.wait [#allocation3], 32  }
   0xb   :  { %930 = vsyncadd [#allocation3], 4294967264 }
   0xc   :  { %931 = dma.done.wait [#allocation6], 2064  }
   0xd   :  { %932 = vsyncadd [#allocation6], 4294965232  ;;  %v77_v0 = vld [vmem:[#allocation7 + $0x78] sm:$0xff]  ;;  %v76_v1 = vld [vmem:[#allocation7 + $0x70] sm:$0xff]  ;;  %s940_s5 = smov [#allocation8]   ;;  %s810_s9 = sshll.u32 %s1380_s4, 4  ;;  %s811_s9 = int_to_ptr.hbm [resolvable:$true] %s810_s9 }
   0xe   :  { %v75_v2 = vld [vmem:[#allocation7 + $0x68] sm:$0xff]  ;;  %v975_v3 = vand.u32 4294901760, %v77_v0  ;;  %v977_v4 = vand.u32 4294901760, %v76_v1  ;;  %v74_v6 = vld [vmem:[#allocation7 + $0x60] sm:$0xff]  ;;  %v73_v7 = vld [vmem:[#allocation7 + $0x58] sm:$0xff]  ;;  %s808_s6 = sshll.u32 %s940_s5, 4  ;;  %s809_s6 = int_to_ptr.vmem [resolvable:$true] %s808_s6 }
   0xf   :  { %v979_v5 = vand.u32 4294901760, %v75_v2  ;;  %v72_v8 = vld [vmem:[#allocation7 + $0x50] sm:$0xff]  ;;  %v981_v9 = vand.u32 4294901760, %v74_v6  ;;  %v983_v10 = vand.u32 4294901760, %v73_v7  ;;  %v71_v12 = vld [vmem:[#allocation7 + $0x48] sm:$0xff]  ;;  %v70_v13 = vld [vmem:[#allocation7 + $0x40] sm:$0xff] }
  0x10   :  { %v985_v11 = vand.u32 4294901760, %v72_v8  ;;  %79 = vmatpush.msra.mxu0 %v975_v3  ;;  %v989_v14 = vsub.f32 %v77_v0, %v975_v3  ;;  %v992_v15 = vsub.f32 %v76_v1, %v977_v4  ;;  %v997_v17 = vand.u32 4294901760, %v71_v12  ;;  %v69_v18 = vld [vmem:[#allocation7 + $0x38] sm:$0xff]  ;;  %275 = vmatpush.msra.mxu3 %v975_v3  ;;  %v68_v26 = vld [vmem:[#allocation7 + $0x30] sm:$0xff]  ;;  %v67_v36 = vld [vmem:[#allocation7 + $0x28] sm:$0xff] }
  0x11   :  { %v995_v16 = vsub.f32 %v75_v2, %v979_v5  ;;  %v1001_v19 = vsub.f32 %v74_v6, %v981_v9  ;;  %v1004_v20 = vsub.f32 %v73_v7, %v983_v10  ;;  %v1019_v25 = vand.u32 4294901760, %v70_v13  ;;  %v66_v42 = vld [vmem:[#allocation7 + $0x20] sm:$0xff]  ;;  %v65_v47 = vld [vmem:[#allocation7 + $0x18] sm:$0xff]  ;;  %v64_v55 = vld [vmem:[#allocation7 + $0x10] sm:$0xff] }
  0x12   :  { %v1007_v21 = vsub.f32 %v72_v8, %v985_v11  ;;  %81 = vmatpush.msra.mxu0 %v977_v4  ;;  %v1011_v22 = vand.u32 4294901760, %v989_v14  ;;  %v1014_v23 = vand.u32 4294901760, %v992_v15  ;;  %222 = vmatpush.msra.mxu2 %v989_v14  ;;  %v1025_v28 = vand.u32 4294901760, %v69_v18  ;;  %v63_v60 = vld [vmem:[#allocation7 + $0x8] sm:$0xff]  ;;  %v62_v1 = vld [vmem:[#allocation7] sm:$0xff] }
  0x13   :  { %v1017_v24 = vand.u32 4294901760, %v995_v16  ;;  %v1023_v27 = vand.u32 4294901760, %v1001_v19  ;;  %v1028_v29 = vsub.f32 %v71_v12, %v997_v17  ;;  %277 = vmatpush.msra.mxu3 %v977_v4  ;;  %v1039_v33 = vand.u32 4294901760, %v1004_v20  ;;  %v1129_v7 = vld [vmem:[#allocation2] sm:$0x3] }
  0x14   :  { %83 = vmatpush.msra.mxu0 %v979_v5  ;;  %v122_v30 = vsub.f32 %v989_v14, %v1011_v22  ;;  %v128_v31 = vsub.f32 %v992_v15, %v1014_v23  ;;  %225 = vmatpush.msra.mxu2 %v992_v15  ;;  %v1043_v34 = vand.u32 4294901760, %v1007_v21  ;;  %v1045_v35 = vand.u32 4294901760, %v68_v26  ;;  %1395 = vst [vmem:[#allocation18_spill] sm:$0xff] %v1129_v7 }
  0x15   :  { %v134_v32 = vsub.f32 %v995_v16, %v1017_v24  ;;  %279 = vmatpush.msra.mxu3 %v979_v5  ;;  %v140_v39 = vsub.f32 %v1001_v19, %v1023_v27  ;;  %v1056_v40 = vsub.f32 %v70_v13, %v1019_v25  ;;  %v1060_v41 = vand.u32 4294901760, %v1028_v29 }
  0x16   :  { %v1048_v37 = vand.u32 4294901760, %v122_v30  ;;  %85 = vmatpush.msra.mxu0 %v981_v9  ;;  %v1051_v38 = vand.u32 4294901760, %v128_v31  ;;  %228 = vmatpush.msra.mxu2 %v995_v16  ;;  %v146_v44 = vsub.f32 %v1004_v20, %v1039_v33  ;;  %v1069_v45 = vand.u32 4294901760, %v67_v36 }
  0x17   :  { %1389 = vst [vmem:[#allocation12_spill] sm:$0xff] %v1056_v40  ;;  %281 = vmatpush.msra.mxu3 %v981_v9  ;;  %v1065_v43 = vand.u32 4294901760, %v134_v32  ;;  %v1072_v46 = vsub.f32 %v69_v18, %v1025_v28  ;;  %v152_v48 = vsub.f32 %v1007_v21, %v1043_v34  ;;  %v1080_v49 = vand.u32 4294901760, %v140_v39 }
  0x18   :  { %124 = vmatpush.msra.mxu1 %v1048_v37  ;;  %87 = vmatpush.msra.mxu0 %v983_v10  ;;  %v1083_v50 = vand.u32 4294901760, %v1056_v40  ;;  %v1085_v51 = vand.u32 4294901760, %v66_v42  ;;  %v1088_v52 = vsub.f32 %v68_v26, %v1045_v35  ;;  %v158_v53 = vsub.f32 %v1028_v29, %v1060_v41 }
  0x19   :  { %1390 = vst [vmem:[#allocation13_spill] sm:$0xff] %v1072_v46  ;;  %231 = vmatpush.msra.mxu2 %v1001_v19  ;;  %283 = vmatpush.msra.mxu3 %v983_v10  ;;  %v1092_v54 = vand.u32 4294901760, %v65_v47  ;;  %v1098_v56 = vand.u32 4294901760, %v146_v44  ;;  %v1101_v57 = vand.u32 4294901760, %v1072_v46  ;;  %v1104_v58 = vsub.f32 %v67_v36, %v1069_v45 }
  0x1a   :  { %130 = vmatpush.msra.mxu1 %v1051_v38  ;;  %89 = vmatpush.msra.mxu0 %v985_v11  ;;  %1391 = vst [vmem:[#allocation14_spill] sm:$0xff] %v1088_v52  ;;  %v1106_v59 = vand.u32 4294901760, %v152_v48  ;;  %v164_v61 = vsub.f32 %v1056_v40, %v1083_v50  ;;  %v1115_v62 = vand.u32 4294901760, %v1088_v52  ;;  %v1117_v63 = vand.u32 4294901760, %v64_v55 }
  0x1b   :  { %234 = vmatpush.msra.mxu2 %v1004_v20  ;;  %285 = vmatpush.msra.mxu3 %v985_v11  ;;  %1392 = vst [vmem:[#allocation15_spill] sm:$0xff] %v1104_v58  ;;  %v1120_v0 = vsub.f32 %v66_v42, %v1085_v51  ;;  %v1122_v2 = vand.u32 4294901760, %v158_v53  ;;  %v1125_v6 = vsub.f32 %v65_v47, %v1092_v54  ;;  %v1136_v12 = vand.u32 4294901760, %v1104_v58 }
  0x1c   :  { %136 = vmatpush.msra.mxu1 %v1065_v43  ;;  %91 = vmatpush.msra.mxu0 %v997_v17  ;;  %v170_v8 = vsub.f32 %v1072_v46, %v1101_v57  ;;  %v1138_v13 = vand.u32 4294901760, %v63_v60  ;;  %v1141_v18 = vand.u32 4294901760, %v1129_v7  ;;  %v1143_v26 = vand.u32 4294901760, %v62_v1 }
  0x1d   :  { %237 = vmatpush.msra.mxu2 %v1007_v21  ;;  %287 = vmatpush.msra.mxu3 %v997_v17  ;;  %1393 = vst [vmem:[#allocation16_spill] sm:$0xff] %v1120_v0  ;;  %v1149_v30 = vand.u32 4294901760, %v164_v61  ;;  %v176_v31 = vsub.f32 %v1088_v52, %v1115_v62  ;;  %v1154_v32 = vand.u32 4294901760, %v1120_v0  ;;  %v1157_v36 = vsub.f32 %v64_v55, %v1117_v63 }
  0x1e   :  { %142 = vmatpush.msra.mxu1 %v1080_v49  ;;  %93 = vmatpush.msra.mxu0 %v1019_v25  ;;  %1394 = vst [vmem:[#allocation17_spill] sm:$0xff] %v1125_v6  ;;  %v1160_v39 = vand.u32 4294901760, %v1125_v6  ;;  %v1166_v42 = vand.u32 4294901760, %v170_v8  ;;  %v182_v44 = vsub.f32 %v1104_v58, %v1136_v12  ;;  %v1171_v47 = vsub.f32 %v63_v60, %v1138_v13 }
  0x1f   :  { %240 = vmatpush.msra.mxu2 %v1028_v29  ;;  %289 = vmatpush.msra.mxu3 %v1019_v25  ;;  %1396 = vst [vmem:[#allocation19_spill] sm:$0xff] %v1157_v36  ;;  %v111_v48 = vsub.f32 %v1129_v7, %v1141_v18  ;;  %v1179_v53 = vand.u32 4294901760, %v176_v31  ;;  %v188_v55 = vsub.f32 %v1120_v0, %v1154_v32  ;;  %v1184_v61 = vand.u32 4294901760, %v1157_v36 }
  0x20   :  { %148 = vmatpush.msra.mxu1 %v1098_v56  ;;  %95 = vmatpush.msra.mxu0 %v1025_v28  ;;  %v1187_v60 = vsub.f32 %v62_v1, %v1143_v26  ;;  %v1193_v8 = vand.u32 4294901760, %v182_v44  ;;  %v194_v31 = vsub.f32 %v1125_v6, %v1160_v39  ;;  %v1198_v7 = vand.u32 4294901760, %v1171_v47 }
  0x21   :  { %243 = vmatpush.msra.mxu2 %v1056_v40  ;;  %291 = vmatpush.msra.mxu3 %v1025_v28  ;;  %v1204_v1 = vand.u32 4294901760, %v188_v55  ;;  %v200_v44 = vsub.f32 %v1157_v36, %v1184_v61 }
  0x22   :  { %154 = vmatpush.msra.mxu1 %v1106_v59  ;;  %97 = vmatpush.msra.mxu0 %v1045_v35  ;;  %v206_v55 = vsub.f32 %v1171_v47, %v1198_v7 }
  0x23   :  { %246 = vmatpush.msra.mxu2 %v1072_v46  ;;  %293 = vmatpush.msra.mxu3 %v1045_v35 }
  0x24   :  { %160 = vmatpush.msra.mxu1 %v1122_v2  ;;  %99 = vmatpush.msra.mxu0 %v1069_v45 }
  0x25   :  { %249 = vmatpush.msra.mxu2 %v1088_v52  ;;  %295 = vmatpush.msra.mxu3 %v1069_v45  ;;  %v112_v52 = vand.u32 4294901760, %v111_v48 }
  0x26   :  { %166 = vmatpush.msra.mxu1 %v1149_v30  ;;  %101 = vmatpush.msra.mxu0 %v1085_v51 }
  0x27   :  { %252 = vmatpush.msra.mxu2 %v1104_v58  ;;  %297 = vmatpush.msra.mxu3 %v1085_v51  ;;  %v1209_v58 = vand.u32 4294901760, %v1187_v60  ;;  %v113_v46 = vsub.f32 %v111_v48, %v112_v52 }
  0x28   :  { %172 = vmatpush.msra.mxu1 %v1166_v42  ;;  %103 = vmatpush.msra.mxu0 %v1092_v54 }
  0x29   :  { %255 = vmatpush.msra.mxu2 %v1120_v0  ;;  %299 = vmatpush.msra.mxu3 %v1092_v54  ;;  %v1215_v0 = vand.u32 4294901760, %v194_v31  ;;  %v212_v40 = vsub.f32 %v1187_v60, %v1209_v58  ;;  %v1230_v31 = vand.u32 4294901760, %v206_v55 }
  0x2a   :  { %178 = vmatpush.msra.mxu1 %v1179_v53  ;;  %105 = vmatpush.msra.mxu0 %v1117_v63 }
  0x2b   :  { %258 = vmatpush.msra.mxu2 %v1125_v6  ;;  %301 = vmatpush.msra.mxu3 %v1117_v63  ;;  %v1223_v6 = vand.u32 4294901760, %v200_v44  ;;  %v1236_v44 = vand.u32 4294901760, %v212_v40 }
  0x2c   :  { %184 = vmatpush.msra.mxu1 %v1193_v8  ;;  %107 = vmatpush.msra.mxu0 %v1138_v13 }
  0x2d   :  { %261 = vmatpush.msra.mxu2 %v1157_v36  ;;  %303 = vmatpush.msra.mxu3 %v1138_v13  ;;  %v114_v36 = vand.u32 4294901760, %v113_v46 }
  0x2e   :  { %190 = vmatpush.msra.mxu1 %v1204_v1  ;;  %109 = vmatpush.msra.mxu0 %v1143_v26 }
  0x2f   :  { %264 = vmatpush.msra.mxu2 %v1171_v47  ;;  %305 = vmatpush.msra.mxu3 %v1143_v26 }
  0x30   :  { %316 = vmatpush.msrb.mxu0 %v1011_v22  ;;  %196 = vmatpush.msra.mxu1 %v1215_v0 }
  0x31   :  { %267 = vmatpush.msra.mxu2 %v1187_v60  ;;  %309 = vmatmul.f32.vlgmr.msra.gmra.mxu3 %v112_v52 }
  0x32   :  { %320 = vmatpush.msrb.mxu0 %v1014_v23  ;;  %202 = vmatpush.msra.mxu1 %v1223_v6 }
  0x33   :  { %270 = vmatmul.f32.vlgmr.msra.gmra.mxu2 %v111_v48  ;;  %115 = vmatmul.f32.vlgmr.msra.gmra.mxu0 %v114_v36 }
  0x34   :  { %324 = vmatpush.msrb.mxu0 %v1017_v24  ;;  %208 = vmatpush.msra.mxu1 %v1230_v31 }
  0x35   :  { %468 = vmatpush.msrb.mxu3 %v1048_v37  ;;  %423 = vmatpush.msrb.mxu2 %v975_v3 }
  0x36   :  { %328 = vmatpush.msrb.mxu0 %v1023_v27  ;;  %214 = vmatpush.msra.mxu1 %v1236_v44 }
  0x37   :  { %216 = vmatmul.f32.vlgmr.msra.gmra.mxu1 %v1141_v18  ;;  %474 = vmatpush.msrb.mxu3 %v1051_v38 }
  0x38   :  { %383 = vmatpush.msrb.mxu1 %v975_v3  ;;  %332 = vmatpush.msrb.mxu0 %v1039_v33 }
  0x39   :  { %480 = vmatpush.msrb.mxu3 %v1065_v43  ;;  %425 = vmatpush.msrb.mxu2 %v977_v4 }
  0x3a   :  { %385 = vmatpush.msrb.mxu1 %v977_v4  ;;  %336 = vmatpush.msrb.mxu0 %v1043_v34 }
  0x3b   :  { %486 = vmatpush.msrb.mxu3 %v1080_v49  ;;  %427 = vmatpush.msrb.mxu2 %v979_v5 }
  0x3c   :  { %387 = vmatpush.msrb.mxu1 %v979_v5  ;;  %340 = vmatpush.msrb.mxu0 %v1060_v41 }
  0x3d   :  { %492 = vmatpush.msrb.mxu3 %v1098_v56  ;;  %429 = vmatpush.msrb.mxu2 %v981_v9 }
  0x3e   :  { %389 = vmatpush.msrb.mxu1 %v981_v9  ;;  %344 = vmatpush.msrb.mxu0 %v1083_v50 }
  0x3f   :  { %498 = vmatpush.msrb.mxu3 %v1106_v59  ;;  %431 = vmatpush.msrb.mxu2 %v983_v10 }
  0x40   :  { %391 = vmatpush.msrb.mxu1 %v983_v10  ;;  %348 = vmatpush.msrb.mxu0 %v1101_v57 }
  0x41   :  { %504 = vmatpush.msrb.mxu3 %v1122_v2  ;;  %433 = vmatpush.msrb.mxu2 %v985_v11 }
  0x42   :  { %393 = vmatpush.msrb.mxu1 %v985_v11  ;;  %352 = vmatpush.msrb.mxu0 %v1115_v62 }
  0x43   :  { %510 = vmatpush.msrb.mxu3 %v1149_v30  ;;  %435 = vmatpush.msrb.mxu2 %v997_v17 }
  0x44   :  { %395 = vmatpush.msrb.mxu1 %v997_v17  ;;  %356 = vmatpush.msrb.mxu0 %v1136_v12 }
  0x45   :  { %516 = vmatpush.msrb.mxu3 %v1166_v42  ;;  %437 = vmatpush.msrb.mxu2 %v1019_v25 }
  0x46   :  { %397 = vmatpush.msrb.mxu1 %v1019_v25  ;;  %360 = vmatpush.msrb.mxu0 %v1154_v32 }
  0x47   :  { %522 = vmatpush.msrb.mxu3 %v1179_v53  ;;  %439 = vmatpush.msrb.mxu2 %v1025_v28 }
  0x48   :  { %399 = vmatpush.msrb.mxu1 %v1025_v28  ;;  %364 = vmatpush.msrb.mxu0 %v1160_v39 }
  0x49   :  { %528 = vmatpush.msrb.mxu3 %v1193_v8  ;;  %441 = vmatpush.msrb.mxu2 %v1045_v35  ;;  %v827_v8 = vld [vmem:[#allocation5] ss:$0 sm:$0xff] }
  0x4a   :  { %401 = vmatpush.msrb.mxu1 %v1045_v35  ;;  %368 = vmatpush.msrb.mxu0 %v1184_v61 }
  0x4b   :  { %534 = vmatpush.msrb.mxu3 %v1204_v1  ;;  %443 = vmatpush.msrb.mxu2 %v1069_v45 }
  0x4c   :  { %403 = vmatpush.msrb.mxu1 %v1069_v45  ;;  %372 = vmatpush.msrb.mxu0 %v1198_v7 }
  0x4d   :  { %540 = vmatpush.msrb.mxu3 %v1215_v0  ;;  %445 = vmatpush.msrb.mxu2 %v1085_v51 }
  0x4e   :  { %405 = vmatpush.msrb.mxu1 %v1085_v51  ;;  %376 = vmatpush.msrb.mxu0 %v1209_v58 }
  0x4f   :  { %378 = vmatmul.f32.vlgmr.msrb.gmra.mxu0 %v1141_v18  ;;  %546 = vmatpush.msrb.mxu3 %v1223_v6 }
  0x50   :  { %407 = vmatpush.msrb.mxu1 %v1092_v54  ;;  %566 = vmatpush.msra.mxu0 %v989_v14  ;;  %v1403_v14 = vld [vmem:[#allocation19_spill] sm:$0xff] }
  0x51   :  { %552 = vmatpush.msrb.mxu3 %v1230_v31  ;;  %447 = vmatpush.msrb.mxu2 %v1092_v54  ;;  %v828_v31 = vld [vmem:[%s1378_s2] ss:$0 sm:$0xff] }
  0x52   :  { %409 = vmatpush.msrb.mxu1 %v1117_v63  ;;  %569 = vmatpush.msra.mxu0 %v992_v15 }
  0x53   :  { %558 = vmatpush.msrb.mxu3 %v1236_v44  ;;  %449 = vmatpush.msrb.mxu2 %v1117_v63 }
  0x54   :  { %411 = vmatpush.msrb.mxu1 %v1138_v13  ;;  %572 = vmatpush.msra.mxu0 %v995_v16 }
  0x55   :  { %727 = vmatpush.msra.mxu3 %v975_v3  ;;  %451 = vmatpush.msrb.mxu2 %v1138_v13 }
  0x56   :  { %413 = vmatpush.msrb.mxu1 %v1143_v26  ;;  %575 = vmatpush.msra.mxu0 %v1001_v19 }
  0x57   :  { %415 = vmatmul.f32.vlgmr.msrb.gmra.mxu1 %v1141_v18  ;;  %729 = vmatpush.msra.mxu3 %v977_v4 }
  0x58   :  { %619 = vmatpush.msra.mxu1 %v975_v3  ;;  %578 = vmatpush.msra.mxu0 %v1004_v20  ;;  %v1397_v3 = vld [vmem:[#allocation12_spill] sm:$0xff] }
  0x59   :  { %731 = vmatpush.msra.mxu3 %v979_v5  ;;  %453 = vmatpush.msrb.mxu2 %v1143_v26 }
  0x5a   :  { %621 = vmatpush.msra.mxu1 %v977_v4  ;;  %581 = vmatpush.msra.mxu0 %v1007_v21  ;;  %v1398_v4 = vld [vmem:[#allocation13_spill] sm:$0xff] }
  0x5b   :  { %733 = vmatpush.msra.mxu3 %v981_v9  ;;  %660 = vmatpush.msra.mxu2 %v1011_v22 }
  0x5c   :  { %623 = vmatpush.msra.mxu1 %v979_v5  ;;  %584 = vmatpush.msra.mxu0 %v1028_v29  ;;  %v1399_v5 = vld [vmem:[#allocation14_spill] sm:$0xff] }
  0x5d   :  { %735 = vmatpush.msra.mxu3 %v983_v10  ;;  %664 = vmatpush.msra.mxu2 %v1014_v23  ;;  %v1404_v29 = vld [vmem:[#allocation18_spill] sm:$0xff] }
  0x5e   :  { %625 = vmatpush.msra.mxu1 %v981_v9  ;;  %587 = vmatpush.msra.mxu0 %v1397_v3  ;;  %v1400_v9 = vld [vmem:[#allocation15_spill] sm:$0xff] }
  0x5f   :  { %737 = vmatpush.msra.mxu3 %v985_v11  ;;  %668 = vmatpush.msra.mxu2 %v1017_v24 }
  0x60   :  { %627 = vmatpush.msra.mxu1 %v983_v10  ;;  %590 = vmatpush.msra.mxu0 %v1398_v4  ;;  %v1401_v10 = vld [vmem:[#allocation16_spill] sm:$0xff] }
  0x61   :  { %739 = vmatpush.msra.mxu3 %v997_v17  ;;  %672 = vmatpush.msra.mxu2 %v1023_v27 }
  0x62   :  { %629 = vmatpush.msra.mxu1 %v985_v11  ;;  %593 = vmatpush.msra.mxu0 %v1399_v5  ;;  %v1402_v11 = vld [vmem:[#allocation17_spill] sm:$0xff] }
  0x63   :  { %741 = vmatpush.msra.mxu3 %v1019_v25  ;;  %676 = vmatpush.msra.mxu2 %v1039_v33 }
  0x64   :  { %631 = vmatpush.msra.mxu1 %v997_v17  ;;  %596 = vmatpush.msra.mxu0 %v1400_v9 }
  0x65   :  { %743 = vmatpush.msra.mxu3 %v1025_v28  ;;  %680 = vmatpush.msra.mxu2 %v1043_v34 }
  0x66   :  { %633 = vmatpush.msra.mxu1 %v1019_v25  ;;  %599 = vmatpush.msra.mxu0 %v1401_v10 }
  0x67   :  { %745 = vmatpush.msra.mxu3 %v1045_v35  ;;  %684 = vmatpush.msra.mxu2 %v1060_v41 }
  0x68   :  { %635 = vmatpush.msra.mxu1 %v1025_v28  ;;  %602 = vmatpush.msra.mxu0 %v1402_v11 }
  0x69   :  { %747 = vmatpush.msra.mxu3 %v1069_v45  ;;  %688 = vmatpush.msra.mxu2 %v1083_v50 }
  0x6a   :  { %637 = vmatpush.msra.mxu1 %v1045_v35  ;;  %605 = vmatpush.msra.mxu0 %v1403_v14 }
  0x6b   :  { %749 = vmatpush.msra.mxu3 %v1085_v51  ;;  %692 = vmatpush.msra.mxu2 %v1101_v57 }
  0x6c   :  { %639 = vmatpush.msra.mxu1 %v1069_v45  ;;  %608 = vmatpush.msra.mxu0 %v1171_v47 }
  0x6d   :  { %751 = vmatpush.msra.mxu3 %v1092_v54  ;;  %696 = vmatpush.msra.mxu2 %v1115_v62 }
  0x6e   :  { %641 = vmatpush.msra.mxu1 %v1085_v51  ;;  %611 = vmatpush.msra.mxu0 %v1187_v60 }
  0x6f   :  { %753 = vmatpush.msra.mxu3 %v1117_v63  ;;  %700 = vmatpush.msra.mxu2 %v1136_v12 }
  0x70   :  { %643 = vmatpush.msra.mxu1 %v1092_v54 }
  0x71   :  { %755 = vmatpush.msra.mxu3 %v1138_v13  ;;  %704 = vmatpush.msra.mxu2 %v1154_v32 }
  0x72   :  { %645 = vmatpush.msra.mxu1 %v1117_v63 }
  0x73   :  { %757 = vmatpush.msra.mxu3 %v1143_v26  ;;  %708 = vmatpush.msra.mxu2 %v1160_v39 }
  0x74   :  { %647 = vmatpush.msra.mxu1 %v1138_v13 }
  0x75   :  { %712 = vmatpush.msra.mxu2 %v1184_v61 }
  0x76   :  { %649 = vmatpush.msra.mxu1 %v1143_v26 }
  0x77   :  { %716 = vmatpush.msra.mxu2 %v1198_v7 }
  0x79   :  { %720 = vmatpush.msra.mxu2 %v1209_v58 }
  0xb0   :  { %v116_v16 = vpop.f32.mrf.mxu0 }
  0xb4   :  { %v217_v15 = vpop.f32.mrf.mxu1  ;;  %v310_v21 = vpop.f32.mrf.mxu3 }
  0xb5   :  { %v218_v17 = vadd.f32 %v217_v15, %v116_v16 }
  0xb6   :  { %v271_v19 = vpop.f32.mrf.mxu2 }
  0xb7   :  { %v272_v20 = vadd.f32 %v271_v19, %v218_v17 }
  0xb9   :  { %v311_v22 = vadd.f32 %v310_v21, %v272_v20 }
  0xcc   :  { %v379_v23 = vpop.f32.mrf.mxu0 }
  0xcd   :  { %v380_v24 = vadd.f32 %v379_v23, %v311_v22 }
  0xd4   :  { %v416_v25 = vpop.f32.mrf.mxu1 }
  0xd5   :  { %v417_v27 = vadd.f32 %v416_v25, %v380_v24 }
  0xd7   :  { %v419_v28 = vmul.f32 0.03125, %v417_v27 }
  0xd9   :  { %v420_v33 = vsub.f32 %v1404_v29, %v419_v28 }
  0xdb   :  { %v421_v34 = vmul.f32 %v420_v33, %v420_v33 }
  0xdd   :  { %v454_v35 = vand.u32 4294901760, %v421_v34 }
  0xdf   :  { %v455_v37 = vsub.f32 %v421_v34, %v454_v35  ;;  %560 = vmatmul.f32.vlgmr.msrb.gmra.mxu3 %v454_v35 }
  0xe1   :  { %614 = vmatmul.f32.vlgmr.msra.gmra.mxu0 %v455_v37  ;;  %v456_v38 = vand.u32 4294901760, %v455_v37 }
  0xe3   :  { %653 = vmatmul.f32.vlgmr.msra.gmra.mxu1 %v456_v38  ;;  %v457_v40 = vsub.f32 %v455_v37, %v456_v38 }
  0xe5   :  { %v458_v41 = vand.u32 4294901760, %v457_v40 }
  0xe7   :  { %459 = vmatmul.f32.vlgmr.msrb.gmra.mxu2 %v458_v41  ;;  %759 = vmatmul.f32.vlgmr.msra.gmra.mxu3 %v454_v35 }
  0xef   :  { %722 = vmatmul.f32.vlgmr.msra.gmra.mxu2 %v454_v35 }
 0x15e   :  { %v615_v49 = vpop.f32.mrf.mxu0 }
 0x160   :  { %v654_v51 = vpop.f32.mrf.mxu1 }
 0x162   :  { %v561_v43 = vpop.f32.mrf.mxu3 }
 0x16a   :  { %v460_v45 = vpop.f32.mrf.mxu2  ;;  %v760_v57 = vpop.f32.mrf.mxu3 }
 0x16b   :  { %v562_v46 = vadd.f32 %v561_v43, %v460_v45 }
 0x16d   :  { %v616_v50 = vadd.f32 %v615_v49, %v562_v46 }
 0x16f   :  { %v655_v52 = vadd.f32 %v654_v51, %v616_v50 }
 0x172   :  { %v723_v54 = vpop.f32.mrf.mxu2 }
 0x173   :  { %v724_v56 = vadd.f32 %v723_v54, %v655_v52 }
 0x175   :  { %v761_v58 = vadd.f32 %v760_v57, %v724_v56 }
 0x177   :  { %v763_v59 = vmul.f32 0.032258064, %v761_v58 }
 0x179   :  { %829 = vrsqrt.f32 %v763_v59  ;;  %vm771_vm0 = vcmp.eq.f32.partialorder %v763_v59, inf  ;;  %v774_v13 = vand.u32 2147483648, %v763_v59  ;;  %vm773_vm1 = vcmp.eq.f32.partialorder %v763_v59, 0.0 }
 0x17f   :  { %v830_v62 = vpop.eup %829 }
 0x180   :  { %v765_v63 = vmul.f32 %v830_v62, %v763_v59 }
 0x182   :  { %v766_v0 = vmul.f32 %v830_v62, %v765_v63 }
 0x184   :  { %v767_v2 = vmul.f32 0.5, %v766_v0 }
 0x186   :  { %v768_v6 = vsub.f32 1.5, %v767_v2 }
 0x188   :  { %v769_v7 = vmul.f32 %v830_v62, %v768_v6 }
 0x18a   :  { %v770_v12 = vmul.f32 %v769_v7, %v763_v59 }
 0x18c   :  { %v772_v18 = vsel %vm771_vm0, %v763_v59, %v770_v12 }
 0x18d   :  { %v775_v26 = vsel %vm773_vm1, %v774_v13, %v772_v18 }
 0x18e   :  { %v776_v30 = vadd.f32 1e-05, %v775_v26 }
 0x190   :  { %831 = vrcp.f32 %v776_v30  ;;  %v788_v42 = vand.u32 2147483648, %v776_v30  ;;  %v786_v48 = vand.u32 2147483647, %v776_v30  ;;  %vm782_vm3 = vweird.f32 %v776_v30 }
 0x192   :  { %v789_v61 = vor.u32 1.1754944e-38, %v788_v42  ;;  %vm787_vm5 = vcmp.eq.f32.partialorder %v786_v48, 8.507059e+37 }
 0x196   :  { %v832_v32 = vpop.eup %831 }
 0x197   :  { %v778_v36 = vmul.f32 %v832_v32, %v776_v30  ;;  %vm783_vm2 = vweird.f32 %v832_v32 }
 0x198   :  { %vm784_vm4 = vmor %vm782_vm3, %vm783_vm2 }
 0x199   :  { %v779_v39 = vsub.f32 1.0, %v778_v36 }
 0x19b   :  { %v780_v47 = vmul.f32 %v832_v32, %v779_v39 }
 0x19d   :  { %v781_v53 = vadd.f32 %v832_v32, %v780_v47 }
 0x19f   :  { %v785_v60 = vsel %vm784_vm4, %v832_v32, %v781_v53 }
 0x1a0   :  { %v790_v1 = vsel %vm787_vm5, %v789_v61, %v785_v60 }
 0x1a1   :  { %v791_v55 = vmul.f32 %v790_v1, %v420_v33 }
 0x1a3   :  { %v796_v44 = vmul.f32 %v827_v8, %v791_v55 }
 0x1a5   :  { %v801_v3 = vadd.f32 %v828_v31, %v796_v44 }
 0x1a7   :  { %802 = vst [vmem:[#allocation8] sm:$0x3] %v801_v3 }
 0x1a8   :  { %813 = dma.vmem_to_hbm [thread:$0]  %s809_s6, 32, %s811_s9, [#allocation4]  }
 0x1a9   :  { %933 = dma.done.wait [#allocation4], 32  }
 0x1aa   :  { %934 = vsyncadd [#allocation4], 4294967264 }
 0x1ab   :  { %818 = vsyncpa [#allocation3], 1 }
 0x1ac   :  { %819 = vsyncpa [#allocation6], 1 }
 0x1ad   :  { %820 = vsyncpa [#allocation4], 1 }

</bundles_post_ra>
